<compile_context>
chip_gen: v7x
topology: tpu7x:2x2x1
jax: 0.10.0
libtpu: 0.0.40
codegen_flags: <defaults>
</compile_context>

<pallas_src>
import functools
import math

import jax
import jax.numpy as jnp
from jax import lax
from jax.experimental import pallas as pl
from jax.experimental.pallas import tpu as pltpu

_EPS = 1e-8            # nn.CosineSimilarity default eps
_EPS2 = _EPS * _EPS


def _round_up(v, m):
    return ((v + m - 1) // m) * m


def _cdiv(a, b):
    return -(-a // b)


def _vmem_limit_bytes():
    """Physical-VMEM-aware scoped limit: ~48 MiB on v7x (64 MiB/TC), ~96 MiB on
    v5e/v6e (128 MiB).  Falls back to the safe-everywhere 48 MiB."""
    cap = 64 << 20
    try:
        info = pltpu.get_tpu_info()
        cap = int(getattr(info, "vmem_capacity_bytes", cap)) or cap
    except Exception:
        pass
    return max(32 << 20, min(cap * 3 // 4, 100 << 20))


# ----------------------------------------------------------------------------
# Path 1: SimCSE broadcast pattern -> normalized Gram matrix on the MXU
# ----------------------------------------------------------------------------
def _inv_norm_scales(xm, ym, temp):
    # One fused HBM pass per operand, f32 accumulation from the native dtype;
    # eps clamp (per norm, current PyTorch semantics) and 1/temp folded in.
    w1 = jnp.einsum("mh,mh->m", xm, xm, preferred_element_type=jnp.float32)
    w2 = jnp.einsum("nh,nh->n", ym, ym, preferred_element_type=jnp.float32)
    s1 = (lax.rsqrt(jnp.maximum(w1, _EPS2)) * jnp.float32(1.0 / temp))[:, None]  # (M,1)
    s2 = lax.rsqrt(jnp.maximum(w2, _EPS2))[None, :]                              # (1,N)
    return s1, s2


def _gram_cos_kernel(x_ref, y_ref, s1_ref, s2_ref, o_ref):
    # x: (TM, H), y: (TN, H) in native dtype; contract K on the MXU, f32 acc.
    g = lax.dot_general(x_ref[...], y_ref[...], (((1,), (1,)), ((), ())),
                        preferred_element_type=jnp.float32)
    # Epilogue: two broadcast multiplies (rsqrt / temp already folded into scales).
    o_ref[...] = (g * s1_ref[...] * s2_ref[...]).astype(o_ref.dtype)


def _gram_cos_kernel_acc(x_ref, y_ref, s1_ref, s2_ref, o_ref, acc_ref):
    k = pl.program_id(2)

    @pl.when(k == 0)
    def _():
        acc_ref[...] = jnp.zeros_like(acc_ref)

    acc_ref[...] += lax.dot_general(x_ref[...], y_ref[...], (((1,), (1,)), ((), ())),
                                    preferred_element_type=jnp.float32)

    @pl.when(k == pl.num_programs(2) - 1)
    def _():
        o_ref[...] = (acc_ref[...] * s1_ref[...] * s2_ref[...]).astype(o_ref.dtype)


def _pick_gram_tiles(M, N, H, itemsize, budget):
    """Largest (TM, TN) output tile whose single-K working set fits the budget."""
    tm_cap = _round_up(M, 8)
    tn_cap = N if N < 128 else _round_up(N, 128)

    def fits(tm, tn):
        use = 2 * (tm + tn) * H * itemsize      # double-buffered x & y blocks
        use += 2 * tm * tn * 4                  # double-buffered output block (f32-ish)
        use += 2 * (tm + tn) * 4                # scale blocks
        return use <= budget

    pairs = [(512, 512), (512, 256), (256, 256), (256, 128),
             (128, 128), (64, 128), (32, 128), (16, 128), (8, 128)]
    for tm0, tn0 in pairs:
        tm = min(tm0, tm_cap)
        tn = min(tn0, tn_cap)
        if fits(tm, tn):
            # >=2 parallel grid steps so both v7x TensorCores get work.
            if _cdiv(M, tm) * _cdiv(N, tn) < 2 and M >= 16:
                tm = min(tm, _round_up(_cdiv(M, 2), 8))
            return tm, tn
    return None  # gigantic H: single-K block does not fit -> multi-K fallback


def _cosine_gram(xm, ym, temp, out_dtype):
    """xm: [M,H], ym: [N,H] -> [M,N] = cos(xm[i], ym[j]) / temp (native dtype in HBM)."""
    M, H = xm.shape
    N, _ = ym.shape
    s1, s2 = _inv_norm_scales(xm, ym, temp)

    vmem_limit = _vmem_limit_bytes()
    budget = int(vmem_limit * 0.55)
    itemsize = jnp.dtype(xm.dtype).itemsize
    tiles = _pick_gram_tiles(M, N, H, itemsize, budget)

    if tiles is not None:
        TM, TN = tiles
        return pl.pallas_call(
            _gram_cos_kernel,
            out_shape=jax.ShapeDtypeStruct((M, N), out_dtype),
            grid_spec=pltpu.PrefetchScalarGridSpec(
                num_scalar_prefetch=0,
                grid=(_cdiv(M, TM), _cdiv(N, TN)),
                in_specs=[
                    pl.BlockSpec((TM, H), lambda i, j: (i, 0)),
                    pl.BlockSpec((TN, H), lambda i, j: (j, 0)),
                    pl.BlockSpec((TM, 1), lambda i, j: (i, 0)),
                    pl.BlockSpec((1, TN), lambda i, j: (0, j)),
                ],
                out_specs=pl.BlockSpec((TM, TN), lambda i, j: (i, j)),
            ),
            compiler_params=pltpu.CompilerParams(
                dimension_semantics=("parallel", "parallel"),
                vmem_limit_bytes=vmem_limit),
        )(xm, ym, s1, s2)

    # Fallback for enormous H: 3-D grid with K reduction + f32 accumulator.
    TM = min(256, _round_up(M, 8))
    TN = N if N < 128 else min(256, _round_up(N, 128))
    TK = 512
    Hp = _round_up(H, TK)
    xp = jnp.pad(xm, ((0, 0), (0, Hp - H)))   # zeros contribute nothing to the dot
    yp = jnp.pad(ym, ((0, 0), (0, Hp - H)))
    return pl.pallas_call(
        _gram_cos_kernel_acc,
        out_shape=jax.ShapeDtypeStruct((M, N), out_dtype),
        grid_spec=pltpu.PrefetchScalarGridSpec(
            num_scalar_prefetch=0,
            grid=(_cdiv(M, TM), _cdiv(N, TN), Hp // TK),
            in_specs=[
                pl.BlockSpec((TM, TK), lambda i, j, k: (i, k)),
                pl.BlockSpec((TN, TK), lambda i, j, k: (j, k)),
                pl.BlockSpec((TM, 1), lambda i, j, k: (i, 0)),
                pl.BlockSpec((1, TN), lambda i, j, k: (0, j)),
            ],
            out_specs=pl.BlockSpec((TM, TN), lambda i, j, k: (i, j)),
            scratch_shapes=[pltpu.VMEM((TM, TN), jnp.float32)],
        ),
        compiler_params=pltpu.CompilerParams(
            dimension_semantics=("parallel", "parallel", "arbitrary"),
            vmem_limit_bytes=vmem_limit),
    )(xp, yp, s1, s2)


# ----------------------------------------------------------------------------
# Path 2: generic same-shape path -> tiled per-row reduce
# ----------------------------------------------------------------------------
def _cosine_rows_kernel(x_ref, y_ref, o_ref, *, inv_temp):
    # Promote per-tile to f32 for VPU reductions (required on v5e, cheap elsewhere).
    x = x_ref[...].astype(jnp.float32)
    y = y_ref[...].astype(jnp.float32)
    w12 = jnp.sum(x * y, axis=-1, keepdims=True)
    w1 = jnp.sum(x * x, axis=-1, keepdims=True)
    w2 = jnp.sum(y * y, axis=-1, keepdims=True)
    inv = lax.rsqrt(jnp.maximum(w1, _EPS2)) * lax.rsqrt(jnp.maximum(w2, _EPS2))
    o_ref[...] = (w12 * inv * inv_temp).astype(o_ref.dtype)


def _cosine_rows(x2, y2, temp, out_dtype):
    rows, H = x2.shape
    vmem_limit = _vmem_limit_bytes()
    budget = int(vmem_limit * 0.55)
    itemsize = max(jnp.dtype(x2.dtype).itemsize, jnp.dtype(y2.dtype).itemsize)

    # 2 inputs x 2 pipeline buffers per row-tile.  No HBM padding passes: the
    # feature axis is one full-extent block and the row axis uses a cdiv grid
    # with masked boundary tiles (garbage rows never reach the stored output).
    max_rows = max(8, budget // (4 * H * itemsize))
    tile = min(4096, max_rows, _round_up(rows, 8))
    tile = max(8, (tile // 8) * 8)
    if _cdiv(rows, tile) < 2 and rows >= 16:      # keep both v7x TCs busy
        tile = min(tile, _round_up(_cdiv(rows, 2), 8))

    kernel = functools.partial(_cosine_rows_kernel, inv_temp=float(1.0 / temp))
    out = pl.pallas_call(
        kernel,
        out_shape=jax.ShapeDtypeStruct((rows, 1), out_dtype),
        grid_spec=pltpu.PrefetchScalarGridSpec(
            num_scalar_prefetch=0,
            grid=(_cdiv(rows, tile),),
            in_specs=[pl.BlockSpec((tile, H), lambda i: (i, 0)),
                      pl.BlockSpec((tile, H), lambda i: (i, 0))],
            out_specs=pl.BlockSpec((tile, 1), lambda i: (i, 0)),
        ),
        compiler_params=pltpu.CompilerParams(
            dimension_semantics=("parallel",),
            vmem_limit_bytes=vmem_limit),
    )(x2, y2)
    return out[:, 0]


# ----------------------------------------------------------------------------
# Dispatcher: equivalent of Similarity(temp).forward(x, y)
# ----------------------------------------------------------------------------
def similarity(x, y, temp):
    x = jnp.asarray(x)
    y = jnp.asarray(y)
    out_dtype = jnp.result_type(x.dtype, y.dtype)

    # SimCSE broadcast pattern: Gram matrix on the MXU, no [B,B,H] materialization.
    if x.ndim == 3 and y.ndim == 3 and x.shape[-1] == y.shape[-1]:
        if x.shape[1] == 1 and y.shape[0] == 1:
            return _cosine_gram(x[:, 0, :], y[0, :, :], temp, out_dtype)
        if x.shape[0] == 1 and y.shape[1] == 1:
            # cosine similarity is symmetric: out[i, j] = cos(y[i, 0], x[0, j])
            return _cosine_gram(y[:, 0, :], x[0, :, :], temp, out_dtype)

    # Generic path: broadcast like torch, flatten leading dims to rows.
    # (For same-shape inputs -- the common case -- broadcast_to is a no-op.)
    # TODO(synk): express non-trivial leading-dim broadcasts via BlockSpec
    # index_maps instead of materializing them in HBM.
    out_shape = jnp.broadcast_shapes(x.shape, y.shape)
    xb = jnp.broadcast_to(x, out_shape)
    yb = jnp.broadcast_to(y, out_shape)
    hidden = out_shape[-1]
    rows = math.prod(out_shape[:-1]) if out_shape[:-1] else 1
    flat = _cosine_rows(xb.reshape(rows, hidden), yb.reshape(rows, hidden),
                        temp, out_dtype)
    return flat.reshape(out_shape[:-1])


def _reference(x, y, temp):
    x = x.astype(jnp.float32)
    y = y.astype(jnp.float32)
    w12 = jnp.sum(x * y, axis=-1)
    n1 = jnp.maximum(jnp.sqrt(jnp.sum(x * x, axis=-1)), _EPS)
    n2 = jnp.maximum(jnp.sqrt(jnp.sum(y * y, axis=-1)), _EPS)
    return (w12 / (n1 * n2)) / temp


if __name__ == "__main__":
    key = jax.random.PRNGKey(0)
    kx, ky = jax.random.split(key)
    batch, hidden = 8, 32
    temp = 0.05

    # SimCSE-style broadcast usage: [B,1,H] vs [1,B,H] -> [B,B]  (MXU Gram path)
    x = jax.random.normal(kx, (batch, 1, hidden), dtype=jnp.float32)
    y = jax.random.normal(ky, (1, batch, hidden), dtype=jnp.float32)
    out = similarity(x, y, temp)
    jax.block_until_ready(out)
    ref = _reference(jnp.broadcast_to(x, (batch, batch, hidden)),
                     jnp.broadcast_to(y, (batch, batch, hidden)), temp)
    assert out.shape == (batch, batch), out.shape
    assert jnp.allclose(out, ref, atol=1e-4, rtol=1e-4), "gram path mismatch"

    # Same-shape usage: [B,H] vs [B,H] -> [B]  (tiled row-reduce path)
    x2 = jax.random.normal(kx, (batch, hidden), dtype=jnp.float32)
    y2 = jax.random.normal(ky, (batch, hidden), dtype=jnp.float32)
    out2 = similarity(x2, y2, temp)
    jax.block_until_ready(out2)
    ref2 = _reference(x2, y2, temp)
    assert out2.shape == (batch,), out2.shape
    assert jnp.allclose(out2, ref2, atol=1e-4, rtol=1e-4), "row path mismatch"

    # bf16 inputs stay bf16 in HBM (native-speed MXU), f32 accumulation inside.
    xb = x.astype(jnp.bfloat16)
    yb = y.astype(jnp.bfloat16)
    outb = similarity(xb, yb, temp)
    jax.block_until_ready(outb)
    refb = _reference(jnp.broadcast_to(xb, (batch, batch, hidden)),
                      jnp.broadcast_to(yb, (batch, batch, hidden)), temp)
    assert outb.shape == (batch, batch), outb.shape
    assert jnp.allclose(outb.astype(jnp.float32), refb, atol=2e-2, rtol=2e-2), "bf16 mismatch"

    print("KERNEL_OK")
</pallas_src>

<mosaic_0001>
module attributes {stable_mosaic.version = 11 : i64} {
  func.func @_gram_cos_kernel(%arg0: i32, %arg1: i32, %arg2: memref<8x32xf32, #tpu.memory_space<vmem>>, %arg3: memref<8x32xf32, #tpu.memory_space<vmem>>, %arg4: memref<8x1xf32, #tpu.memory_space<vmem>>, %arg5: memref<1x8xf32, #tpu.memory_space<vmem>>, %arg6: memref<8x8xf32, #tpu.memory_space<vmem>>) attributes {dimension_semantics = [#tpu.dimension_semantics<parallel>, #tpu.dimension_semantics<parallel>], iteration_bounds = array<i64: 1, 1>, scalar_prefetch = 0 : i64, scratch_operands = 0 : i64, tpu.core_type = #tpu.core_type<tc>, window_params = [{transform_indices = @transform_0, window_bounds = array<i64: 8, 32>}, {transform_indices = @transform_1, window_bounds = array<i64: 8, 32>}, {transform_indices = @transform_2, window_bounds = array<i64: 8, 1>}, {transform_indices = @transform_3, window_bounds = array<i64: 1, 8>}, {transform_indices = @transform_4, window_bounds = array<i64: 8, 8>}]} {
    %c0 = arith.constant 0 : index
    %c0_0 = arith.constant 0 : index
    %0 = vector.load %arg2[%c0, %c0_0] : memref<8x32xf32, #tpu.memory_space<vmem>>, vector<8x32xf32>
    %c0_1 = arith.constant 0 : index
    %c0_2 = arith.constant 0 : index
    %1 = vector.load %arg3[%c0_1, %c0_2] : memref<8x32xf32, #tpu.memory_space<vmem>>, vector<8x32xf32>
    %cst = arith.constant dense<0.000000e+00> : vector<8x8xf32>
    %2 = tpu.matmul %0, %1, %cst {dimension_numbers = #tpu.dot_dimension_numbers<[1], [1], [0], [0], [0, 0, 1, 0], [], []>} : vector<8x32xf32>, vector<8x32xf32>, vector<8x8xf32> -> vector<8x8xf32>
    %c0_3 = arith.constant 0 : index
    %c0_4 = arith.constant 0 : index
    %3 = vector.load %arg4[%c0_3, %c0_4] : memref<8x1xf32, #tpu.memory_space<vmem>>, vector<8x1xf32>
    %4 = vector.broadcast %3 : vector<8x1xf32> to vector<8x8xf32>
    %5 = arith.mulf %2, %4 : vector<8x8xf32>
    %c0_5 = arith.constant 0 : index
    %c0_6 = arith.constant 0 : index
    %6 = vector.load %arg5[%c0_5, %c0_6] : memref<1x8xf32, #tpu.memory_space<vmem>>, vector<1x8xf32>
    %7 = vector.broadcast %6 : vector<1x8xf32> to vector<8x8xf32>
    %8 = arith.mulf %5, %7 : vector<8x8xf32>
    %c0_7 = arith.constant 0 : index
    %c0_8 = arith.constant 0 : index
    %9 = vector.load %arg6[%c0_7, %c0_8] : memref<8x8xf32, #tpu.memory_space<vmem>>, vector<8x8xf32>
    tpu.vector_store %arg6[%c0_7, %c0_8], %8 {strides = array<i32>} : memref<8x8xf32, #tpu.memory_space<vmem>>, vector<8x8xf32>,
    return
  }
  func.func @transform_0(%arg0: i32, %arg1: i32) -> (i32, i32) {
    %c0_i32 = arith.constant 0 : i32
    %c0_i32_0 = arith.constant 0 : i32
    return %arg0, %c0_i32 : i32, i32
  }
  func.func @transform_1(%arg0: i32, %arg1: i32) -> (i32, i32) {
    %c0_i32 = arith.constant 0 : i32
    %c0_i32_0 = arith.constant 0 : i32
    return %arg1, %c0_i32 : i32, i32
  }
  func.func @transform_2(%arg0: i32, %arg1: i32) -> (i32, i32) {
    %c0_i32 = arith.constant 0 : i32
    %c0_i32_0 = arith.constant 0 : i32
    return %arg0, %c0_i32 : i32, i32
  }
  func.func @transform_3(%arg0: i32, %arg1: i32) -> (i32, i32) {
    %c0_i32 = arith.constant 0 : i32
    %c0_i32_0 = arith.constant 0 : i32
    return %c0_i32, %arg1 : i32, i32
  }
  func.func @transform_4(%arg0: i32, %arg1: i32) -> (i32, i32) {
    %c0_i32 = arith.constant 0 : i32
    return %arg0, %arg1 : i32, i32
  }
}

</mosaic_0001>

<bundles_post_ra>
// kernel: tpu_custom_call.1
= control target key start
LH: loop header
LB: loop body
LE: loop exit
PB: predicated region body
PF: predicated region fallthrough
CT: control target
= control target key end

     0   :  { %9 = vsyncpa [#allocation3], 0  ;;  %s268_s0 = inlined_call_operand.vmem [shape: f32[8,32], index: 0, kind: input, shape index: {}]   ;;  %s269_s1 = inlined_call_operand.hbm [shape: f32[8,32], index: 1, kind: input, shape index: {}]   ;;  %s270_s2 = inlined_call_operand.vmem [shape: f32[8,1], index: 2, kind: input, shape index: {}]   ;;  %s271_s3 = inlined_call_operand.vmem [shape: f32[1,8], index: 3, kind: input, shape index: {}]   ;;  %s272_s4 = inlined_call_operand.hbm [shape: f32[8,8], index: 4, kind: output, shape index: {}]  }
   0x1   :  { %10 = vsyncpa [#allocation4], 0  ;;  %s205_s15 = smov [#allocation2]   ;;  %s157_s19 = scalar_lea.hbm %s269_s1, 128 }
   0x2   :  { %s19_s16 = sshll.u32 %s205_s15, 4  ;;  %p158_p0 = scmp.ne.s32.totalorder %s269_s1, %s157_s19  ;;  %s20_s16 = int_to_ptr.vmem [resolvable:$true] %s19_s16 }
   0x3   :  { %p161_p1 = scmp.lt.u32.totalorder %s157_s19, %s269_s1 }
   0x5   :  { %p163_p2 = pnand %p161_p1, %p158_p0 }
   0x7   :  { %166 = shalt.err (!%p163_p2)
}
   0x8   :  { %s167_s24 = scalar_lea.vmem %s20_s16, 128  ;;  %p172_p4 = scmp.lt.s32.totalorder %s20_s16, %s20_s16 }
   0x9   :  { %p168_p3 = scmp.ne.s32.totalorder %s20_s16, %s167_s24  ;;  %p173_p5 = scmp.lt.s32.totalorder %s167_s24, %s167_s24 }
   0xb   :  { %p174_p6 = por %p173_p5, %p172_p4 }
   0xd   :  { %p175_p7 = pnand %p174_p6, %p168_p3 }
   0xf   :  { %178 = shalt.err (!%p175_p7)
}
  0x10   :  { %22 = dma.hbm_to_vmem [thread:$0]  %s269_s1, 128, %s20_s16, [#allocation3]  }
  0x11   :  { %201 = dma.done.wait [#allocation3], 128  }
  0x12   :  { %202 = vsyncadd [#allocation3], 4294967168  ;;  %v206_v0 = vmov 0.0   ;;  %vm207_vm0 = vmmov 0   ;;  %v208_v1 = vmov 0   ;;  %vm32_vm1 = vcmask 261120  }
  0x13   :  { %146 = vmatprep.subr.mxu0 %v206_v0  ;;  %148 = vmatprep.mubr.msk.f32.mxu0 %vm207_vm0, %v206_v0  ;;  %v31_v2 = vld [vmem:[#allocation2] sm:$0xff]  ;;  %s209_s6 = smov [#allocation5]   ;;  %vm124_vm2 = vcmask 64512  }
  0x14   :  { %156 = vset.pattern.permute.xlu0 %v208_v1  ;;  %v109_v3 = vld [vmem:[%s270_s2] sm:$0xff]  ;;  %147 = vmatpush3.xpose.msk.msra.mxu0 %vm32_vm1, %v31_v2  ;;  %s132_s7 = sshll.u32 %s209_s6, 4  ;;  %s133_s7 = int_to_ptr.vmem [resolvable:$true] %s132_s7 }
  0x15   :  { %v30_v4 = vld [vmem:[%s268_s0] sm:$0xff]  ;;  %112 = vperm.xlu0 %156, %v109_v3   ;;  %s179_s2 = scalar_lea.vmem %s133_s7, 128  ;;  %p184_p9 = scmp.lt.s32.totalorder %s133_s7, %s133_s7 }
  0x16   :  { %v143_v7 = vld [vmem:[%s271_s3] ss:$0 sm:$0xff]  ;;  %p180_p8 = scmp.ne.s32.totalorder %s133_s7, %s179_s2  ;;  %p185_p10 = scmp.lt.s32.totalorder %s179_s2, %s179_s2 }
  0x17   :  { %149 = vmatmul.mubr.msk.f32.vlgmr.msra.gmra.mrb[0].mxu0 %vm32_vm1, %v30_v4 }
  0x18   :  { %p186_p11 = por %p185_p10, %p184_p9 }
  0x1a   :  { %p187_p12 = pnand %p186_p11, %p180_p8 }
  0x94   :  { %v113_v5 = vpop.permute.xlu0 %112 }
  0xea   :  { %v105_v6 = vpop.f32.mrb[0].mxu0 }
  0xeb   :  { %v115_v8 = vmul.f32 %v113_v5, %v105_v6  ;;  %v150_v9 = vpop.f32.mrb[1].mxu0 }
  0xed   :  { %v123_v10 = vmul.f32 %v143_v7, %v115_v8 }
  0xef   :  { %125 = vst.msk [vmem:[#allocation5] sm:$0xff] %vm124_vm2, %v123_v10 }
  0xf0   :  { %190 = shalt.err (!%p187_p12)
}
  0xf1   :  { %s191_s9 = scalar_lea.hbm %s272_s4, 128 }
  0xf2   :  { %p192_p13 = scmp.ne.s32.totalorder %s272_s4, %s191_s9  ;;  %p195_p0 = scmp.lt.u32.totalorder %s191_s9, %s272_s4 }
  0xf4   :  { %p197_p1 = pnand %p195_p0, %p192_p13 }
  0xf6   :  { %200 = shalt.err (!%p197_p1)
}
  0xf7   :  { %135 = dma.vmem_to_hbm [thread:$0]  %s133_s7, 128, %s272_s4, [#allocation4]  }
  0xf8   :  { %203 = dma.done.wait [#allocation4], 128  }
  0xf9   :  { %204 = vsyncadd [#allocation4], 4294967168 }
  0xfa   :  { %139 = vsyncpa [#allocation3], 1 }
  0xfb   :  { %140 = vsyncpa [#allocation4], 1 }

</bundles_post_ra>
